<compile_context>
chip_gen: v7x
topology: tpu7x:2x2x1
jax: 0.10.0
libtpu: 0.0.40
codegen_flags: <defaults>
</compile_context>

<pallas_src>
import functools

import jax
import jax.numpy as jnp
from jax import lax
from jax.experimental import pallas as pl
from jax.experimental.pallas import tpu as pltpu

_LANES = 128           # batch elements per lane row
_MAX_TILE_ROWS = 2048  # rows/grid step: 4 MiB in + 1 MiB out, ~10.5 MiB dbl-buffered
_CHUNK_ROWS = 128      # inner-loop chunk that bounds vreg live ranges


def _round_up(n, m):
    return ((n + m - 1) // m) * m


def _sigmoid(h):
    # sigmoid(x) == 0.5 * tanh(0.5 * x) + 0.5  -- a single EUP op per call.
    return 0.5 * jnp.tanh(0.5 * h) + 0.5


def _discriminator_kernel(w1_ref, b1_ref, w2_ref, b2_ref, x_ref, out_ref,
                          *, chunk_rows, n_chunks):
    """sigmoid(W2 @ sigmoid(W1 @ x + b1) + b2), feature-major, pure VPU/EUP.

    Refs:
      w1_ref : SMEM (12,) f32  -- W1[j, i] stored at index 4*j + i
      b1_ref : SMEM (3,)  f32
      w2_ref : SMEM (3,)  f32  -- W2[0, j]
      b2_ref : SMEM (1,)  f32
      x_ref  : VMEM (4, TILE_ROWS, 128)  feature-major batch slab
      out_ref: VMEM (1, TILE_ROWS, 128)
    """

    def one_chunk(c, carry):
        r0 = pl.multiple_of(c * chunk_rows, chunk_rows)
        x0 = x_ref[0, pl.ds(r0, chunk_rows), :]
        x1 = x_ref[1, pl.ds(r0, chunk_rows), :]
        x2 = x_ref[2, pl.ds(r0, chunk_rows), :]
        x3 = x_ref[3, pl.ds(r0, chunk_rows), :]

        acc = None
        for j in range(3):  # 3 hidden units; unrolled at trace time
            h = (w1_ref[4 * j + 0] * x0
                 + w1_ref[4 * j + 1] * x1
                 + w1_ref[4 * j + 2] * x2
                 + w1_ref[4 * j + 3] * x3
                 + b1_ref[j])
            term = w2_ref[j] * _sigmoid(h)
            acc = term if acc is None else acc + term

        out_ref[0, pl.ds(r0, chunk_rows), :] = _sigmoid(acc + b2_ref[0])
        return carry

    lax.fori_loop(0, n_chunks, one_chunk, 0, unroll=True)


@functools.partial(jax.jit, static_argnames=("feature_major",))
def discriminator_forward_flat(x, w1, b1, w2, b2, *, feature_major=False):
    """Returns a flat (B,) f32 result (lane-dense epilogue, no (B,1) relayout).

    x: (B, 4) by default (torch layout), or (4, B) with feature_major=True
    (preferred producer layout -- skips the wrapper transpose pass entirely).
    Params follow torch.nn.Linear shapes: w1 (3,4), b1 (3,), w2 (1,3), b2 (1,).
    """
    if feature_major:
        xt = x.astype(jnp.float32)        # (4, B) -- no transpose needed
        B = xt.shape[1]
    else:
        B = x.shape[0]
        xt = x.astype(jnp.float32).T      # fused with the pad below: one HBM pass

    # --- tiling -------------------------------------------------------------
    rows_needed = pl.cdiv(B, _LANES)
    if rows_needed <= _CHUNK_ROWS:
        tile_rows = _round_up(rows_needed, 8)
        chunk_rows = tile_rows
    else:
        rows_padded = _round_up(rows_needed, _CHUNK_ROWS)
        tile_rows = min(_MAX_TILE_ROWS, rows_padded)
        if tile_rows == rows_padded and rows_padded > 4 * _CHUNK_ROWS:
            # Keep >= 2 grid steps so v7x's two TensorCores both get work.
            tile_rows = _round_up(pl.cdiv(rows_padded, 2), _CHUNK_ROWS)
        chunk_rows = _CHUNK_ROWS
    n_chunks = tile_rows // chunk_rows
    grid_steps = pl.cdiv(rows_needed, tile_rows)
    total_rows = grid_steps * tile_rows
    bp = total_rows * _LANES

    # Single fused transpose+pad pass; reshape to (4, total_rows, 128) is free.
    x_3d = jnp.pad(xt, ((0, 0), (0, bp - B))).reshape(4, total_rows, _LANES)

    w1_flat = w1.astype(jnp.float32).reshape(-1)   # (12,)
    b1_flat = b1.astype(jnp.float32).reshape(-1)   # (3,)
    w2_flat = w2.astype(jnp.float32).reshape(-1)   # (3,)
    b2_flat = b2.astype(jnp.float32).reshape(-1)   # (1,)

    smem_spec = pl.BlockSpec(memory_space=pltpu.MemorySpace.SMEM)
    kernel = functools.partial(_discriminator_kernel,
                               chunk_rows=chunk_rows, n_chunks=n_chunks)

    out_3d = pl.pallas_call(
        kernel,
        out_shape=jax.ShapeDtypeStruct((1, total_rows, _LANES), jnp.float32),
        grid=(grid_steps,),
        in_specs=[
            smem_spec, smem_spec, smem_spec, smem_spec,
            pl.BlockSpec((4, tile_rows, _LANES), lambda i: (0, i, 0)),
        ],
        out_specs=pl.BlockSpec((1, tile_rows, _LANES), lambda i: (0, i, 0)),
        compiler_params=pltpu.CompilerParams(
            dimension_semantics=("parallel",),
            vmem_limit_bytes=32 * 1024 * 1024),   # big tiles also fit on v5e
        cost_estimate=pl.CostEstimate(
            flops=30 * bp,             # 2*(4*3 + 3*1) MACs per element
            transcendentals=4 * bp,    # 3 + 1 sigmoids per element
            bytes_accessed=20 * bp),   # 16 B in + 4 B out per element
    )(w1_flat, b1_flat, w2_flat, b2_flat, x_3d)

    # Lane-dense 1-D slice; padded batch tail (finite, unobserved) is dropped.
    return out_3d.reshape(bp)[:B]


def discriminator_forward(x, w1, b1, w2, b2):
    """Torch-shaped API: x (B, 4) f32 -> (B, 1) f32."""
    return discriminator_forward_flat(x, w1, b1, w2, b2).reshape(-1, 1)


def _reference_forward(x, w1, b1, w2, b2):
    """Pure-JAX reference matching torch semantics (elementwise, no MXU rounding)."""
    h = jax.nn.sigmoid(jnp.sum(x[:, None, :] * w1[None, :, :], axis=-1) + b1)
    y = jax.nn.sigmoid(jnp.sum(h[:, None, :] * w2[None, :, :], axis=-1) + b2)
    return y


def _init_params(key):
    """Deterministic init mimicking torch.nn.Linear default U(-k, k), k=1/sqrt(fan_in)."""
    k1, k2, k3, k4 = jax.random.split(key, 4)
    bound1 = 1.0 / jnp.sqrt(4.0)   # fan_in = 4
    w1 = jax.random.uniform(k1, (3, 4), jnp.float32, -bound1, bound1)
    b1 = jax.random.uniform(k2, (3,), jnp.float32, -bound1, bound1)
    bound2 = 1.0 / jnp.sqrt(3.0)   # fan_in = 3
    w2 = jax.random.uniform(k3, (1, 3), jnp.float32, -bound2, bound2)
    b2 = jax.random.uniform(k4, (1,), jnp.float32, -bound2, bound2)
    return w1, b1, w2, b2


if __name__ == "__main__":
    key = jax.random.PRNGKey(0)
    kx, kp, kx2 = jax.random.split(key, 3)

    w1, b1, w2, b2 = _init_params(kp)

    # Small primary example (matches the torch module's 4-feature input).
    B = 2
    x = jax.random.normal(kx, (B, 4), jnp.float32)
    out = jax.block_until_ready(discriminator_forward(x, w1, b1, w2, b2))
    ref = _reference_forward(x, w1, b1, w2, b2)
    assert out.shape == (B, 1)
    assert bool(jnp.all(jnp.isfinite(out)))
    assert jnp.allclose(out, ref, atol=1e-5, rtol=1e-5)

    # Feature-major entry (preferred producer layout, no transpose pass).
    out_fm = jax.block_until_ready(
        discriminator_forward_flat(x.T, w1, b1, w2, b2, feature_major=True))
    assert jnp.allclose(out_fm.reshape(B, 1), ref, atol=1e-5, rtol=1e-5)

    # Moderate batch to exercise the chunked multi-vreg path.
    B2 = 33000
    x2 = jax.random.normal(kx2, (B2, 4), jnp.float32)
    out2 = jax.block_until_ready(discriminator_forward(x2, w1, b1, w2, b2))
    ref2 = _reference_forward(x2, w1, b1, w2, b2)
    assert out2.shape == (B2, 1)
    assert jnp.allclose(out2, ref2, atol=1e-5, rtol=1e-5)

    print("KERNEL_OK")
</pallas_src>

<mosaic_0001>
module attributes {stable_mosaic.version = 11 : i64} {
  func.func @_discriminator_kernel(%arg0: i32, %arg1: memref<12xf32, #tpu.memory_space<smem>>, %arg2: memref<3xf32, #tpu.memory_space<smem>>, %arg3: memref<3xf32, #tpu.memory_space<smem>>, %arg4: memref<1xf32, #tpu.memory_space<smem>>, %arg5: memref<4x8x128xf32, #tpu.memory_space<vmem>>, %arg6: memref<1x8x128xf32, #tpu.memory_space<vmem>>) attributes {dimension_semantics = [#tpu.dimension_semantics<parallel>], iteration_bounds = array<i64: 1>, scalar_prefetch = 0 : i64, scratch_operands = 0 : i64, tpu.core_type = #tpu.core_type<tc>, window_params = [{transform_indices = @transform_0, window_bounds = array<i64: 12>}, {transform_indices = @transform_1, window_bounds = array<i64: 3>}, {transform_indices = @transform_2, window_bounds = array<i64: 3>}, {transform_indices = @transform_3, window_bounds = array<i64: 1>}, {transform_indices = @transform_4, window_bounds = array<i64: 4, 8, 128>}, {transform_indices = @transform_5, window_bounds = array<i64: 1, 8, 128>}]} {
    %c0_i32 = arith.constant 0 : i32
    %c8_i32 = arith.constant 8 : i32
    %0 = arith.muli %c0_i32, %c8_i32 : i32
    %1 = tpu.assume_multiple %0, 8 : i32
    %c0 = arith.constant 0 : index
    %2 = arith.index_cast %1 : i32 to index
    %c0_0 = arith.constant 0 : index
    %3 = vector.load %arg5[%c0, %2, %c0_0] : memref<4x8x128xf32, #tpu.memory_space<vmem>>, vector<1x8x128xf32>
    %4 = vector.shape_cast %3 : vector<1x8x128xf32> to vector<8x128xf32>
    %c1 = arith.constant 1 : index
    %5 = arith.index_cast %1 : i32 to index
    %c0_1 = arith.constant 0 : index
    %6 = vector.load %arg5[%c1, %5, %c0_1] : memref<4x8x128xf32, #tpu.memory_space<vmem>>, vector<1x8x128xf32>
    %7 = vector.shape_cast %6 : vector<1x8x128xf32> to vector<8x128xf32>
    %c2 = arith.constant 2 : index
    %8 = arith.index_cast %1 : i32 to index
    %c0_2 = arith.constant 0 : index
    %9 = vector.load %arg5[%c2, %8, %c0_2] : memref<4x8x128xf32, #tpu.memory_space<vmem>>, vector<1x8x128xf32>
    %10 = vector.shape_cast %9 : vector<1x8x128xf32> to vector<8x128xf32>
    %c3 = arith.constant 3 : index
    %11 = arith.index_cast %1 : i32 to index
    %c0_3 = arith.constant 0 : index
    %12 = vector.load %arg5[%c3, %11, %c0_3] : memref<4x8x128xf32, #tpu.memory_space<vmem>>, vector<1x8x128xf32>
    %13 = vector.shape_cast %12 : vector<1x8x128xf32> to vector<8x128xf32>
    %c0_4 = arith.constant 0 : index
    %14 = memref.load %arg1[%c0_4] : memref<12xf32, #tpu.memory_space<smem>>
    %15 = vector.broadcast %14 : f32 to vector<8x128xf32>
    %16 = arith.mulf %15, %4 : vector<8x128xf32>
    %c1_5 = arith.constant 1 : index
    %17 = memref.load %arg1[%c1_5] : memref<12xf32, #tpu.memory_space<smem>>
    %18 = vector.broadcast %17 : f32 to vector<8x128xf32>
    %19 = arith.mulf %18, %7 : vector<8x128xf32>
    %20 = arith.addf %16, %19 : vector<8x128xf32>
    %c2_6 = arith.constant 2 : index
    %21 = memref.load %arg1[%c2_6] : memref<12xf32, #tpu.memory_space<smem>>
    %22 = vector.broadcast %21 : f32 to vector<8x128xf32>
    %23 = arith.mulf %22, %10 : vector<8x128xf32>
    %24 = arith.addf %20, %23 : vector<8x128xf32>
    %c3_7 = arith.constant 3 : index
    %25 = memref.load %arg1[%c3_7] : memref<12xf32, #tpu.memory_space<smem>>
    %26 = vector.broadcast %25 : f32 to vector<8x128xf32>
    %27 = arith.mulf %26, %13 : vector<8x128xf32>
    %28 = arith.addf %24, %27 : vector<8x128xf32>
    %c0_8 = arith.constant 0 : index
    %29 = memref.load %arg2[%c0_8] : memref<3xf32, #tpu.memory_space<smem>>
    %30 = vector.broadcast %29 : f32 to vector<8x128xf32>
    %31 = arith.addf %28, %30 : vector<8x128xf32>
    %c0_9 = arith.constant 0 : index
    %32 = memref.load %arg3[%c0_9] : memref<3xf32, #tpu.memory_space<smem>>
    %cst = arith.constant 5.000000e-01 : f32
    %33 = vector.broadcast %cst : f32 to vector<8x128xf32>
    %34 = arith.mulf %33, %31 : vector<8x128xf32>
    %35 = math.tanh %34 : vector<8x128xf32>
    %cst_10 = arith.constant 5.000000e-01 : f32
    %36 = vector.broadcast %cst_10 : f32 to vector<8x128xf32>
    %37 = arith.mulf %36, %35 : vector<8x128xf32>
    %cst_11 = arith.constant 5.000000e-01 : f32
    %38 = vector.broadcast %cst_11 : f32 to vector<8x128xf32>
    %39 = arith.addf %37, %38 : vector<8x128xf32>
    %40 = vector.broadcast %32 : f32 to vector<8x128xf32>
    %41 = arith.mulf %40, %39 : vector<8x128xf32>
    %c4 = arith.constant 4 : index
    %42 = memref.load %arg1[%c4] : memref<12xf32, #tpu.memory_space<smem>>
    %43 = vector.broadcast %42 : f32 to vector<8x128xf32>
    %44 = arith.mulf %43, %4 : vector<8x128xf32>
    %c5 = arith.constant 5 : index
    %45 = memref.load %arg1[%c5] : memref<12xf32, #tpu.memory_space<smem>>
    %46 = vector.broadcast %45 : f32 to vector<8x128xf32>
    %47 = arith.mulf %46, %7 : vector<8x128xf32>
    %48 = arith.addf %44, %47 : vector<8x128xf32>
    %c6 = arith.constant 6 : index
    %49 = memref.load %arg1[%c6] : memref<12xf32, #tpu.memory_space<smem>>
    %50 = vector.broadcast %49 : f32 to vector<8x128xf32>
    %51 = arith.mulf %50, %10 : vector<8x128xf32>
    %52 = arith.addf %48, %51 : vector<8x128xf32>
    %c7 = arith.constant 7 : index
    %53 = memref.load %arg1[%c7] : memref<12xf32, #tpu.memory_space<smem>>
    %54 = vector.broadcast %53 : f32 to vector<8x128xf32>
    %55 = arith.mulf %54, %13 : vector<8x128xf32>
    %56 = arith.addf %52, %55 : vector<8x128xf32>
    %c1_12 = arith.constant 1 : index
    %57 = memref.load %arg2[%c1_12] : memref<3xf32, #tpu.memory_space<smem>>
    %58 = vector.broadcast %57 : f32 to vector<8x128xf32>
    %59 = arith.addf %56, %58 : vector<8x128xf32>
    %c1_13 = arith.constant 1 : index
    %60 = memref.load %arg3[%c1_13] : memref<3xf32, #tpu.memory_space<smem>>
    %cst_14 = arith.constant 5.000000e-01 : f32
    %61 = vector.broadcast %cst_14 : f32 to vector<8x128xf32>
    %62 = arith.mulf %61, %59 : vector<8x128xf32>
    %63 = math.tanh %62 : vector<8x128xf32>
    %cst_15 = arith.constant 5.000000e-01 : f32
    %64 = vector.broadcast %cst_15 : f32 to vector<8x128xf32>
    %65 = arith.mulf %64, %63 : vector<8x128xf32>
    %cst_16 = arith.constant 5.000000e-01 : f32
    %66 = vector.broadcast %cst_16 : f32 to vector<8x128xf32>
    %67 = arith.addf %65, %66 : vector<8x128xf32>
    %68 = vector.broadcast %60 : f32 to vector<8x128xf32>
    %69 = arith.mulf %68, %67 : vector<8x128xf32>
    %70 = arith.addf %41, %69 : vector<8x128xf32>
    %c8 = arith.constant 8 : index
    %71 = memref.load %arg1[%c8] : memref<12xf32, #tpu.memory_space<smem>>
    %72 = vector.broadcast %71 : f32 to vector<8x128xf32>
    %73 = arith.mulf %72, %4 : vector<8x128xf32>
    %c9 = arith.constant 9 : index
    %74 = memref.load %arg1[%c9] : memref<12xf32, #tpu.memory_space<smem>>
    %75 = vector.broadcast %74 : f32 to vector<8x128xf32>
    %76 = arith.mulf %75, %7 : vector<8x128xf32>
    %77 = arith.addf %73, %76 : vector<8x128xf32>
    %c10 = arith.constant 10 : index
    %78 = memref.load %arg1[%c10] : memref<12xf32, #tpu.memory_space<smem>>
    %79 = vector.broadcast %78 : f32 to vector<8x128xf32>
    %80 = arith.mulf %79, %10 : vector<8x128xf32>
    %81 = arith.addf %77, %80 : vector<8x128xf32>
    %c11 = arith.constant 11 : index
    %82 = memref.load %arg1[%c11] : memref<12xf32, #tpu.memory_space<smem>>
    %83 = vector.broadcast %82 : f32 to vector<8x128xf32>
    %84 = arith.mulf %83, %13 : vector<8x128xf32>
    %85 = arith.addf %81, %84 : vector<8x128xf32>
    %c2_17 = arith.constant 2 : index
    %86 = memref.load %arg2[%c2_17] : memref<3xf32, #tpu.memory_space<smem>>
    %87 = vector.broadcast %86 : f32 to vector<8x128xf32>
    %88 = arith.addf %85, %87 : vector<8x128xf32>
    %c2_18 = arith.constant 2 : index
    %89 = memref.load %arg3[%c2_18] : memref<3xf32, #tpu.memory_space<smem>>
    %cst_19 = arith.constant 5.000000e-01 : f32
    %90 = vector.broadcast %cst_19 : f32 to vector<8x128xf32>
    %91 = arith.mulf %90, %88 : vector<8x128xf32>
    %92 = math.tanh %91 : vector<8x128xf32>
    %cst_20 = arith.constant 5.000000e-01 : f32
    %93 = vector.broadcast %cst_20 : f32 to vector<8x128xf32>
    %94 = arith.mulf %93, %92 : vector<8x128xf32>
    %cst_21 = arith.constant 5.000000e-01 : f32
    %95 = vector.broadcast %cst_21 : f32 to vector<8x128xf32>
    %96 = arith.addf %94, %95 : vector<8x128xf32>
    %97 = vector.broadcast %89 : f32 to vector<8x128xf32>
    %98 = arith.mulf %97, %96 : vector<8x128xf32>
    %99 = arith.addf %70, %98 : vector<8x128xf32>
    %c0_22 = arith.constant 0 : index
    %100 = memref.load %arg4[%c0_22] : memref<1xf32, #tpu.memory_space<smem>>
    %101 = vector.broadcast %100 : f32 to vector<8x128xf32>
    %102 = arith.addf %99, %101 : vector<8x128xf32>
    %cst_23 = arith.constant 5.000000e-01 : f32
    %103 = vector.broadcast %cst_23 : f32 to vector<8x128xf32>
    %104 = arith.mulf %103, %102 : vector<8x128xf32>
    %105 = math.tanh %104 : vector<8x128xf32>
    %cst_24 = arith.constant 5.000000e-01 : f32
    %106 = vector.broadcast %cst_24 : f32 to vector<8x128xf32>
    %107 = arith.mulf %106, %105 : vector<8x128xf32>
    %cst_25 = arith.constant 5.000000e-01 : f32
    %108 = vector.broadcast %cst_25 : f32 to vector<8x128xf32>
    %109 = arith.addf %107, %108 : vector<8x128xf32>
    %c0_26 = arith.constant 0 : index
    %110 = arith.index_cast %1 : i32 to index
    %c0_27 = arith.constant 0 : index
    %111 = vector.load %arg6[%c0_26, %110, %c0_27] : memref<1x8x128xf32, #tpu.memory_space<vmem>>, vector<1x8x128xf32>
    %112 = vector.shape_cast %111 : vector<1x8x128xf32> to vector<8x128xf32>
    %113 = vector.shape_cast %109 : vector<8x128xf32> to vector<1x8x128xf32>
    tpu.vector_store %arg6[%c0_26, %110, %c0_27], %113 {strides = array<i32>} : memref<1x8x128xf32, #tpu.memory_space<vmem>>, vector<1x8x128xf32>,
    %c1_i32 = arith.constant 1 : i32
    return
  }
  func.func @transform_0(%arg0: i32) -> i32 {
    %c0_i32 = arith.constant 0 : i32
    %c0_i32_0 = arith.constant 0 : i32
    return %c0_i32 : i32
  }
  func.func @transform_1(%arg0: i32) -> i32 {
    %c0_i32 = arith.constant 0 : i32
    %c0_i32_0 = arith.constant 0 : i32
    return %c0_i32 : i32
  }
  func.func @transform_2(%arg0: i32) -> i32 {
    %c0_i32 = arith.constant 0 : i32
    %c0_i32_0 = arith.constant 0 : i32
    return %c0_i32 : i32
  }
  func.func @transform_3(%arg0: i32) -> i32 {
    %c0_i32 = arith.constant 0 : i32
    %c0_i32_0 = arith.constant 0 : i32
    return %c0_i32 : i32
  }
  func.func @transform_4(%arg0: i32) -> (i32, i32, i32) {
    %c0_i32 = arith.constant 0 : i32
    %c0_i32_0 = arith.constant 0 : i32
    %c0_i32_1 = arith.constant 0 : i32
    return %c0_i32, %arg0, %c0_i32_0 : i32, i32, i32
  }
  func.func @transform_5(%arg0: i32) -> (i32, i32, i32) {
    %c0_i32 = arith.constant 0 : i32
    %c0_i32_0 = arith.constant 0 : i32
    %c0_i32_1 = arith.constant 0 : i32
    return %c0_i32, %arg0, %c0_i32_0 : i32, i32, i32
  }
}

</mosaic_0001>

<bundles_post_ra>
// kernel: discriminator_forward_flat.1
= control target key start
LH: loop header
LB: loop body
LE: loop exit
PB: predicated region body
PF: predicated region fallthrough
CT: control target
= control target key end

     0   :  { %11 = vsyncpa [#allocation4], 0  ;;  %s296_s0 = inlined_call_operand.vmem [shape: f32[12], index: 0, kind: input, shape index: {}]   ;;  %s297_s1 = inlined_call_operand.vmem [shape: f32[3], index: 1, kind: input, shape index: {}]   ;;  %s298_s2 = inlined_call_operand.vmem [shape: f32[3], index: 2, kind: input, shape index: {}]   ;;  %s299_s3 = inlined_call_operand.<no memory space> [shape: f32[1], index: 3, kind: input, shape index: {}]   ;;  %s300_s4 = inlined_call_operand.vmem [shape: f32[4,8,128], index: 4, kind: input, shape index: {}]   ;;  %s301_s5 = inlined_call_operand.vmem [shape: f32[1,8,128], index: 5, kind: output, shape index: {}]  }
   0x1   :  { %12 = vsyncpa [#allocation6], 0  ;;  %s29_s20 = sshll.u32 %s297_s1, 4  ;;  %s19_s23 = sshll.u32 %s296_s0, 4  ;;  %s30_s20 = int_to_ptr.vmem [resolvable:$true] %s29_s20  ;;  %s20_s23 = int_to_ptr.vmem [resolvable:$true] %s19_s23 }
   0x2   :  { %s190_s24 = scalar_lea.vmem %s30_s20, 16  ;;  %p195_p1 = scmp.lt.s32.totalorder %s30_s20, %s30_s20 }
   0x3   :  { %p191_p0 = scmp.ne.s32.totalorder %s30_s20, %s190_s24  ;;  %p196_p2 = scmp.lt.s32.totalorder %s190_s24, %s190_s24 }
   0x5   :  { %p197_p3 = por %p196_p2, %p195_p1 }
   0x7   :  { %p198_p4 = pnand %p197_p3, %p191_p0 }
   0x9   :  { %201 = shalt.err (!%p198_p4)
}
   0xa   :  { %s230_s25 = smov [#allocation5]   ;;  %s202_s26 = scalar_lea.vmem %s20_s23, 16 }
   0xb   :  { %32 = dma.vmem_to_smem %s30_s20, 16, %s230_s25, [#allocation6]  }
   0xc   :  { %p203_p5 = scmp.ne.s32.totalorder %s20_s23, %s202_s26  ;;  %p207_p6 = scmp.lt.s32.totalorder %s20_s23, %s20_s23 }
   0xd   :  { %p208_p7 = scmp.lt.s32.totalorder %s202_s26, %s202_s26 }
   0xf   :  { %p209_p8 = por %p208_p7, %p207_p6 }
  0x11   :  { %p210_p9 = pnand %p209_p8, %p203_p5 }
  0x13   :  { %213 = shalt.err (!%p210_p9)
}
  0x14   :  { %s231_s1 = smov [#allocation3]   ;;  %s39_s28 = sshll.u32 %s298_s2, 4  ;;  %s40_s28 = int_to_ptr.vmem [resolvable:$true] %s39_s28 }
  0x15   :  { %22 = dma.vmem_to_smem %s20_s23, 16, %s231_s1, [#allocation4]  }
  0x16   :  { %s214_s29 = scalar_lea.vmem %s40_s28, 16  ;;  %p219_p11 = scmp.lt.s32.totalorder %s40_s28, %s40_s28 }
  0x17   :  { %p215_p10 = scmp.ne.s32.totalorder %s40_s28, %s214_s29  ;;  %p220_p12 = scmp.lt.s32.totalorder %s214_s29, %s214_s29 }
  0x19   :  { %p221_p13 = por %p220_p12, %p219_p11 }
  0x1b   :  { %p222_p0 = pnand %p221_p13, %p215_p10 }
  0x1d   :  { %225 = shalt.err (!%p222_p0)
}
  0x1e   :  { %s232_s30 = smov [#allocation7]  }
  0x1f   :  { %42 = dma.vmem_to_smem %s40_s28, 16, %s232_s30, [#allocation6]  }
  0x20   :  { %226 = dma.done.wait [#allocation4], 16  }
  0x21   :  { %227 = vsyncadd [#allocation4], 4294967280 }
  0x22   :  { %228 = dma.done.wait [#allocation6], 32  }
  0x23   :  { %229 = vsyncadd [#allocation6], 4294967264 }
  0x24   :  { %56 = sfence }
  0x25   :  { %s67_s6 = sld [smem:[#allocation3]]  ;;  %s164_s7 = sld [smem:[#allocation3 + $0x1]]  ;;  %v57_v0 = vld [vmem:[%s300_s4] sm:$0xff]  ;;  %v161_v1 = vld [vmem:[%s300_s4 + $0x8] sm:$0xff]  ;;  %v162_v2 = vld [vmem:[%s300_s4 + $0x10] sm:$0xff]  ;;  %v145_v62 = vstv %s299_s3 }
  0x26   :  { %s165_s8 = sld [smem:[#allocation3 + $0x2]]  ;;  %s166_s9 = sld [smem:[#allocation3 + $0x3]]  ;;  %v163_v3 = vld [vmem:[%s300_s4 + $0x18] sm:$0xff] }
  0x27   :  { %s272_s2 = sld [smem:[#allocation5]]  ;;  %s167_s10 = sld [smem:[#allocation3 + $0x4]] }
  0x28   :  { %s168_s13 = sld [smem:[#allocation3 + $0x5]]  ;;  %s169_s14 = sld [smem:[#allocation3 + $0x6]] }
  0x29   :  { %s170_s19 = sld [smem:[#allocation3 + $0x7]]  ;;  %s173_s22 = sld [smem:[#allocation3 + $0x8]] }
  0x2a   :  { %s174_s23 = sld [smem:[#allocation3 + $0x9]]  ;;  %s175_s24 = sld [smem:[#allocation3 + $0xa]] }
  0x2b   :  { %v68_v4 = vstv %s67_s6  ;;  %v71_v6 = vstv %s164_s7  ;;  %s286_s25 = sld [smem:[#allocation5 + $0x1]]  ;;  %s176_s26 = sld [smem:[#allocation3 + $0xb]] }
  0x2c   :  { %v69_v5 = vmul.f32 %v68_v4, %v57_v0  ;;  %v75_v7 = vstv %s165_s8  ;;  %v72_v8 = vmul.f32 %v161_v1, %v71_v6  ;;  %v79_v10 = vstv %s166_s9  ;;  %s177_s4 = sld [smem:[#allocation5 + $0x2]]  ;;  %s85_s1 = sld [smem:[#allocation7]] }
  0x2d   :  { %v76_v9 = vmul.f32 %v162_v2, %v75_v7  ;;  %v80_v11 = vmul.f32 %v163_v3, %v79_v10  ;;  %v93_v12 = vstv %s167_s10  ;;  %v83_v21 = vstv %s272_s2  ;;  %s172_s0 = sld [smem:[#allocation7 + $0x1]]  ;;  %s178_s27 = sld [smem:[#allocation7 + $0x2]] }
  0x2e   :  { %v73_v13 = vadd.f32 %v72_v8, %v69_v5  ;;  %v94_v14 = vmul.f32 %v93_v12, %v57_v0  ;;  %v96_v15 = vstv %s168_s13  ;;  %v100_v16 = vstv %s169_s14 }
  0x2f   :  { %v97_v17 = vmul.f32 %v161_v1, %v96_v15  ;;  %v101_v18 = vmul.f32 %v162_v2, %v100_v16  ;;  %v104_v19 = vstv %s170_s19  ;;  %v119_v23 = vstv %s173_s22 }
  0x30   :  { %v77_v20 = vadd.f32 %v76_v9, %v73_v13  ;;  %v105_v22 = vmul.f32 %v163_v3, %v104_v19  ;;  %v120_v25 = vmul.f32 %v119_v23, %v57_v0  ;;  %v122_v26 = vstv %s174_s23 }
  0x31   :  { %v98_v24 = vadd.f32 %v97_v17, %v94_v14  ;;  %v126_v27 = vstv %s175_s24  ;;  %v123_v29 = vmul.f32 %v161_v1, %v122_v26  ;;  %v130_v31 = vstv %s176_s26 }
  0x32   :  { %v81_v28 = vadd.f32 %v80_v11, %v77_v20  ;;  %v127_v30 = vmul.f32 %v162_v2, %v126_v27  ;;  %v108_v34 = vstv %s286_s25  ;;  %v131_v36 = vmul.f32 %v163_v3, %v130_v31 }
  0x33   :  { %v102_v32 = vadd.f32 %v101_v18, %v98_v24  ;;  %v124_v35 = vadd.f32 %v123_v29, %v120_v25  ;;  %v134_v41 = vstv %s177_s4  ;;  %v90_v50 = vstv %s85_s1 }
  0x34   :  { %v84_v33 = vadd.f32 %v83_v21, %v81_v28  ;;  %v115_v52 = vstv %s172_s0  ;;  %v141_v58 = vstv %s178_s27 }
  0x35   :  { %v106_v37 = vadd.f32 %v105_v22, %v102_v32  ;;  %v128_v39 = vadd.f32 %v127_v30, %v124_v35 }
  0x36   :  { %v86_v38 = vmul.f32 0.5, %v84_v33 }
  0x37   :  { %v109_v40 = vadd.f32 %v108_v34, %v106_v37  ;;  %v132_v42 = vadd.f32 %v131_v36, %v128_v39 }
  0x38   :  { %182 = vtanh.f32 %v86_v38 }
  0x39   :  { %v111_v43 = vmul.f32 0.5, %v109_v40  ;;  %v135_v44 = vadd.f32 %v134_v41, %v132_v42 }
  0x3b   :  { %184 = vtanh.f32 %v111_v43  ;;  %v137_v45 = vmul.f32 0.5, %v135_v44 }
  0x3d   :  { %186 = vtanh.f32 %v137_v45 }
  0x42   :  { %v183_v46 = vpop.eup %182 }
  0x43   :  { %v88_v47 = vmul.f32 0.5, %v183_v46 }
  0x45   :  { %v185_v48 = vpop.eup %184  ;;  %v89_v49 = vadd.f32 0.5, %v88_v47 }
  0x46   :  { %v113_v51 = vmul.f32 0.5, %v185_v48 }
  0x47   :  { %v187_v53 = vpop.eup %186  ;;  %v91_v54 = vmul.f32 %v90_v50, %v89_v49 }
  0x48   :  { %v114_v55 = vadd.f32 0.5, %v113_v51  ;;  %v139_v56 = vmul.f32 0.5, %v187_v53 }
  0x4a   :  { %v116_v57 = vmul.f32 %v115_v52, %v114_v55  ;;  %v140_v59 = vadd.f32 0.5, %v139_v56 }
  0x4c   :  { %v117_v60 = vadd.f32 %v116_v57, %v91_v54  ;;  %v142_v61 = vmul.f32 %v141_v58, %v140_v59 }
  0x4e   :  { %v143_v63 = vadd.f32 %v142_v61, %v117_v60 }
  0x50   :  { %v146_v0 = vadd.f32 %v145_v62, %v143_v63 }
  0x52   :  { %v147_v1 = vmul.f32 0.5, %v146_v0 }
  0x54   :  { %188 = vtanh.f32 %v147_v1 }
  0x5e   :  { %v189_v2 = vpop.eup %188 }
  0x5f   :  { %v149_v3 = vmul.f32 0.5, %v189_v2 }
  0x61   :  { %v150_v4 = vadd.f32 0.5, %v149_v3 }
  0x63   :  { %151 = vst [vmem:[%s301_s5] sm:$0xff] %v150_v4 }
  0x64   :  { %156 = vsyncpa [#allocation4], 1 }
  0x65   :  { %157 = vsyncpa [#allocation6], 1 }

</bundles_post_ra>
